<compile_context>
chip_gen: v7x
topology: tpu7x:2x2x1
jax: 0.10.0
libtpu: 0.0.40
codegen_flags: <defaults>
</compile_context>

<pallas_src>
import jax
import jax.numpy as jnp
from jax.experimental import pallas as pl
from jax.experimental.pallas import tpu as pltpu

LANE = 128  # TPU lane width; fc3/fc4 dims and the output are padded to multiples of this.


def ramnet_kernel(x_ref, w1_ref, b1_ref, w2_ref, b2_ref, w3_ref, b3_ref,
                  w4_ref, b4_ref, o_ref):
    # Cast input to bf16 in-kernel (free on the VPU; avoids an extra HBM pass in the wrapper).
    h = x_ref[...].astype(jnp.bfloat16)
    # fc1 + relu (bf16 matmul, f32 accumulate, f32 bias)
    h = jnp.dot(h, w1_ref[...], preferred_element_type=jnp.float32) + b1_ref[...]
    h = jnp.maximum(h, 0.0).astype(jnp.bfloat16)
    # fc2 + relu
    h = jnp.dot(h, w2_ref[...], preferred_element_type=jnp.float32) + b2_ref[...]
    h = jnp.maximum(h, 0.0).astype(jnp.bfloat16)
    # fc3 + relu (output padded to 128 columns; padded lanes are exactly 0)
    h = jnp.dot(h, w3_ref[...], preferred_element_type=jnp.float32) + b3_ref[...]
    h = jnp.maximum(h, 0.0).astype(jnp.bfloat16)
    # fc4 (no activation), 128 lane-dense padded output columns, stored as bf16
    out = jnp.dot(h, w4_ref[...], preferred_element_type=jnp.float32) + b4_ref[...]
    o_ref[...] = out.astype(o_ref.dtype)


def _auto_tile_b(B, cap=1024):
    """Pick the batch tile: as large as possible (cap 1024 -> safe on every generation's VMEM)
    while keeping >= 2 grid steps when B allows it (both TensorCores on v7x)."""
    half = (B + 1) // 2
    tile = ((half + LANE - 1) // LANE) * LANE
    return max(LANE, min(tile, cap))


def ramnet_forward(x, params, out_dim, tile_b=None, out_dtype=jnp.float32):
    """x: (B, in_dim) float32. params: bf16 weights (in, out) / f32 biases (1, out), with
    fc3/fc4 dims padded per init_params. Returns (B, out_dim) in out_dtype."""
    B, in_dim = x.shape
    out_pad = params["w4"].shape[1]

    if tile_b is None:
        tile_b = _auto_tile_b(B)
    # Keep tile_b a multiple of 16 (bf16 output sublane packing; also covers f32's 8).
    tile_b = max(16, (tile_b // 16) * 16)

    # Pad batch up to a multiple of the tile so the grid covers it exactly.
    b_pad = pl.cdiv(B, tile_b) * tile_b
    x_p = x if b_pad == B else jnp.pad(x, ((0, b_pad - B), (0, 0)))

    const = lambda i: (0, 0)  # weight/bias blocks: same block every grid step -> stay resident
    out_padded = pl.pallas_call(
        ramnet_kernel,
        out_shape=jax.ShapeDtypeStruct((b_pad, out_pad), jnp.bfloat16),
        grid=(b_pad // tile_b,),
        in_specs=[
            pl.BlockSpec((tile_b, in_dim), lambda i: (i, 0)),      # x tile (f32)
            pl.BlockSpec(params["w1"].shape, const),
            pl.BlockSpec(params["b1"].shape, const),
            pl.BlockSpec(params["w2"].shape, const),
            pl.BlockSpec(params["b2"].shape, const),
            pl.BlockSpec(params["w3"].shape, const),
            pl.BlockSpec(params["b3"].shape, const),
            pl.BlockSpec(params["w4"].shape, const),
            pl.BlockSpec(params["b4"].shape, const),
        ],
        out_specs=pl.BlockSpec((tile_b, out_pad), lambda i: (i, 0)),
        compiler_params=pltpu.CompilerParams(
            dimension_semantics=("parallel",),   # megacore sharding on v7x; harmless elsewhere
        ),
    )(x_p, params["w1"], params["b1"], params["w2"], params["b2"],
      params["w3"], params["b3"], params["w4"], params["b4"])

    return out_padded[:B, :out_dim].astype(out_dtype)


def init_params(key, in_dim, out_dim):
    """Mimics nn.Linear's U(-1/sqrt(fan_in), 1/sqrt(fan_in)) init.
    Weights stored as (in, out) bf16 (transpose of PyTorch's (out, in)), biases f32 (1, out).
    fc3's output / fc4's input are zero-padded 64->128, and fc4's output is zero-padded to a
    multiple of 128, so all K/N matmul dims are lane-dense. Padding is exact (zeros)."""
    dims = [(in_dim, 256), (256, 128), (128, 64), (64, out_dim)]
    out_pad = pl.cdiv(out_dim, LANE) * LANE
    params = {}
    for i, (fan_in, fan_out) in enumerate(dims, start=1):
        key, kw, kb = jax.random.split(key, 3)
        bound = 1.0 / float(fan_in) ** 0.5
        w = jax.random.uniform(kw, (fan_in, fan_out), jnp.float32, -bound, bound)
        b = jax.random.uniform(kb, (1, fan_out), jnp.float32, -bound, bound)
        if i == 3:  # pad fc3 output columns 64 -> 128 (zeros; ReLU keeps them 0)
            w = jnp.pad(w, ((0, 0), (0, LANE - fan_out)))
            b = jnp.pad(b, ((0, 0), (0, LANE - fan_out)))
        if i == 4:  # pad fc4 input rows 64 -> 128 and output columns -> out_pad (zeros)
            w = jnp.pad(w, ((0, LANE - fan_in), (0, out_pad - fan_out)))
            b = jnp.pad(b, ((0, 0), (0, out_pad - fan_out)))
        params[f"w{i}"] = w.astype(jnp.bfloat16)
        params[f"b{i}"] = b  # biases stay f32 (added after f32 accumulation)
    return params


def reference_forward(x, params, out_dim):
    """Pure-JAX reference replicating the kernel's bf16-matmul / f32-accumulate / bf16-store math."""
    h = x.astype(jnp.bfloat16)
    for i in range(1, 5):
        h = jnp.dot(h, params[f"w{i}"], preferred_element_type=jnp.float32) + params[f"b{i}"]
        if i < 4:
            h = jnp.maximum(h, 0.0).astype(jnp.bfloat16)
    h = h.astype(jnp.bfloat16).astype(jnp.float32)  # mirror kernel's bf16 output store
    return h[:, :out_dim]


if __name__ == "__main__":
    key = jax.random.PRNGKey(0)
    in_dim, out_dim, batch = 128, 6, 256   # Atari RAM = 128 bytes, 6 actions
    kx, kp = jax.random.split(key)
    x = jax.random.uniform(kx, (batch, in_dim), jnp.float32)
    params = init_params(kp, in_dim, out_dim)

    out = ramnet_forward(x, params, out_dim)   # auto tile: 128 rows -> 2 grid steps
    jax.block_until_ready(out)

    ref = reference_forward(x, params, out_dim)
    assert out.shape == (batch, out_dim)
    assert jnp.allclose(out, ref, atol=1e-2, rtol=1e-2), \
        f"max abs err = {jnp.max(jnp.abs(out - ref))}"
    print("KERNEL_OK")
</pallas_src>

<mosaic_0001>
module attributes {stable_mosaic.version = 11 : i64} {
  func.func @ramnet_kernel(%arg0: i32, %arg1: memref<128x128xf32, #tpu.memory_space<vmem>>, %arg2: memref<128x256xbf16, #tpu.memory_space<vmem>>, %arg3: memref<1x256xf32, #tpu.memory_space<vmem>>, %arg4: memref<256x128xbf16, #tpu.memory_space<vmem>>, %arg5: memref<1x128xf32, #tpu.memory_space<vmem>>, %arg6: memref<128x128xbf16, #tpu.memory_space<vmem>>, %arg7: memref<1x128xf32, #tpu.memory_space<vmem>>, %arg8: memref<128x128xbf16, #tpu.memory_space<vmem>>, %arg9: memref<1x128xf32, #tpu.memory_space<vmem>>, %arg10: memref<128x128xbf16, #tpu.memory_space<vmem>>) attributes {dimension_semantics = [#tpu.dimension_semantics<parallel>], iteration_bounds = array<i64: 2>, scalar_prefetch = 0 : i64, scratch_operands = 0 : i64, tpu.core_type = #tpu.core_type<tc>, window_params = [{transform_indices = @transform_0, window_bounds = array<i64: 128, 128>}, {pipeline_mode = #tpu.pipeline_mode<synchronous>, transform_indices = @transform_1, window_bounds = array<i64: 128, 256>}, {pipeline_mode = #tpu.pipeline_mode<synchronous>, transform_indices = @transform_2, window_bounds = array<i64: 1, 256>}, {pipeline_mode = #tpu.pipeline_mode<synchronous>, transform_indices = @transform_3, window_bounds = array<i64: 256, 128>}, {pipeline_mode = #tpu.pipeline_mode<synchronous>, transform_indices = @transform_4, window_bounds = array<i64: 1, 128>}, {pipeline_mode = #tpu.pipeline_mode<synchronous>, transform_indices = @transform_5, window_bounds = array<i64: 128, 128>}, {pipeline_mode = #tpu.pipeline_mode<synchronous>, transform_indices = @transform_6, window_bounds = array<i64: 1, 128>}, {pipeline_mode = #tpu.pipeline_mode<synchronous>, transform_indices = @transform_7, window_bounds = array<i64: 128, 128>}, {pipeline_mode = #tpu.pipeline_mode<synchronous>, transform_indices = @transform_8, window_bounds = array<i64: 1, 128>}, {transform_indices = @transform_9, window_bounds = array<i64: 128, 128>}]} {
    %c0 = arith.constant 0 : index
    %c0_0 = arith.constant 0 : index
    %0 = vector.load %arg1[%c0, %c0_0] : memref<128x128xf32, #tpu.memory_space<vmem>>, vector<128x128xf32>
    %1 = arith.truncf %0 : vector<128x128xf32> to vector<128x128xbf16>
    %c0_1 = arith.constant 0 : index
    %c0_2 = arith.constant 0 : index
    %2 = vector.load %arg2[%c0_1, %c0_2] : memref<128x256xbf16, #tpu.memory_space<vmem>>, vector<128x256xbf16>
    %cst = arith.constant dense<0.000000e+00> : vector<128x256xf32>
    %3 = tpu.matmul %1, %2, %cst {dimension_numbers = #tpu.dot_dimension_numbers<[1], [0], [0], [1], [0, 0, 1, 1], [], []>} : vector<128x128xbf16>, vector<128x256xbf16>, vector<128x256xf32> -> vector<128x256xf32>
    %c0_3 = arith.constant 0 : index
    %c0_4 = arith.constant 0 : index
    %4 = vector.load %arg3[%c0_3, %c0_4] : memref<1x256xf32, #tpu.memory_space<vmem>>, vector<1x256xf32>
    %5 = vector.broadcast %4 : vector<1x256xf32> to vector<128x256xf32>
    %6 = arith.addf %3, %5 : vector<128x256xf32>
    %cst_5 = arith.constant 0.000000e+00 : f32
    %7 = vector.broadcast %cst_5 : f32 to vector<128x256xf32>
    %8 = arith.maximumf %6, %7 : vector<128x256xf32>
    %9 = arith.truncf %8 : vector<128x256xf32> to vector<128x256xbf16>
    %c0_6 = arith.constant 0 : index
    %c0_7 = arith.constant 0 : index
    %10 = vector.load %arg4[%c0_6, %c0_7] : memref<256x128xbf16, #tpu.memory_space<vmem>>, vector<256x128xbf16>
    %cst_8 = arith.constant dense<0.000000e+00> : vector<128x128xf32>
    %11 = tpu.matmul %9, %10, %cst_8 {dimension_numbers = #tpu.dot_dimension_numbers<[1], [0], [0], [1], [0, 0, 1, 1], [], []>} : vector<128x256xbf16>, vector<256x128xbf16>, vector<128x128xf32> -> vector<128x128xf32>
    %c0_9 = arith.constant 0 : index
    %c0_10 = arith.constant 0 : index
    %12 = vector.load %arg5[%c0_9, %c0_10] : memref<1x128xf32, #tpu.memory_space<vmem>>, vector<1x128xf32>
    %13 = vector.broadcast %12 : vector<1x128xf32> to vector<128x128xf32>
    %14 = arith.addf %11, %13 : vector<128x128xf32>
    %cst_11 = arith.constant 0.000000e+00 : f32
    %15 = vector.broadcast %cst_11 : f32 to vector<128x128xf32>
    %16 = arith.maximumf %14, %15 : vector<128x128xf32>
    %17 = arith.truncf %16 : vector<128x128xf32> to vector<128x128xbf16>
    %c0_12 = arith.constant 0 : index
    %c0_13 = arith.constant 0 : index
    %18 = vector.load %arg6[%c0_12, %c0_13] : memref<128x128xbf16, #tpu.memory_space<vmem>>, vector<128x128xbf16>
    %cst_14 = arith.constant dense<0.000000e+00> : vector<128x128xf32>
    %19 = tpu.matmul %17, %18, %cst_14 {dimension_numbers = #tpu.dot_dimension_numbers<[1], [0], [0], [1], [0, 0, 1, 1], [], []>} : vector<128x128xbf16>, vector<128x128xbf16>, vector<128x128xf32> -> vector<128x128xf32>
    %c0_15 = arith.constant 0 : index
    %c0_16 = arith.constant 0 : index
    %20 = vector.load %arg7[%c0_15, %c0_16] : memref<1x128xf32, #tpu.memory_space<vmem>>, vector<1x128xf32>
    %21 = vector.broadcast %20 : vector<1x128xf32> to vector<128x128xf32>
    %22 = arith.addf %19, %21 : vector<128x128xf32>
    %cst_17 = arith.constant 0.000000e+00 : f32
    %23 = vector.broadcast %cst_17 : f32 to vector<128x128xf32>
    %24 = arith.maximumf %22, %23 : vector<128x128xf32>
    %25 = arith.truncf %24 : vector<128x128xf32> to vector<128x128xbf16>
    %c0_18 = arith.constant 0 : index
    %c0_19 = arith.constant 0 : index
    %26 = vector.load %arg8[%c0_18, %c0_19] : memref<128x128xbf16, #tpu.memory_space<vmem>>, vector<128x128xbf16>
    %cst_20 = arith.constant dense<0.000000e+00> : vector<128x128xf32>
    %27 = tpu.matmul %25, %26, %cst_20 {dimension_numbers = #tpu.dot_dimension_numbers<[1], [0], [0], [1], [0, 0, 1, 1], [], []>} : vector<128x128xbf16>, vector<128x128xbf16>, vector<128x128xf32> -> vector<128x128xf32>
    %c0_21 = arith.constant 0 : index
    %c0_22 = arith.constant 0 : index
    %28 = vector.load %arg9[%c0_21, %c0_22] : memref<1x128xf32, #tpu.memory_space<vmem>>, vector<1x128xf32>
    %29 = vector.broadcast %28 : vector<1x128xf32> to vector<128x128xf32>
    %30 = arith.addf %27, %29 : vector<128x128xf32>
    %31 = arith.truncf %30 : vector<128x128xf32> to vector<128x128xbf16>
    %c0_23 = arith.constant 0 : index
    %c0_24 = arith.constant 0 : index
    %32 = vector.load %arg10[%c0_23, %c0_24] : memref<128x128xbf16, #tpu.memory_space<vmem>>, vector<128x128xbf16>
    tpu.vector_store %arg10[%c0_23, %c0_24], %31 {strides = array<i32>} : memref<128x128xbf16, #tpu.memory_space<vmem>>, vector<128x128xbf16>,
    return
  }
  func.func @transform_0(%arg0: i32) -> (i32, i32) {
    %c0_i32 = arith.constant 0 : i32
    %c0_i32_0 = arith.constant 0 : i32
    return %arg0, %c0_i32 : i32, i32
  }
  func.func @transform_1(%arg0: i32) -> (i32, i32) {
    %c0_i32 = arith.constant 0 : i32
    %c0_i32_0 = arith.constant 0 : i32
    %c0_i32_1 = arith.constant 0 : i32
    return %c0_i32, %c0_i32_0 : i32, i32
  }
  func.func @transform_2(%arg0: i32) -> (i32, i32) {
    %c0_i32 = arith.constant 0 : i32
    %c0_i32_0 = arith.constant 0 : i32
    %c0_i32_1 = arith.constant 0 : i32
    return %c0_i32, %c0_i32_0 : i32, i32
  }
  func.func @transform_3(%arg0: i32) -> (i32, i32) {
    %c0_i32 = arith.constant 0 : i32
    %c0_i32_0 = arith.constant 0 : i32
    %c0_i32_1 = arith.constant 0 : i32
    return %c0_i32, %c0_i32_0 : i32, i32
  }
  func.func @transform_4(%arg0: i32) -> (i32, i32) {
    %c0_i32 = arith.constant 0 : i32
    %c0_i32_0 = arith.constant 0 : i32
    %c0_i32_1 = arith.constant 0 : i32
    return %c0_i32, %c0_i32_0 : i32, i32
  }
  func.func @transform_5(%arg0: i32) -> (i32, i32) {
    %c0_i32 = arith.constant 0 : i32
    %c0_i32_0 = arith.constant 0 : i32
    %c0_i32_1 = arith.constant 0 : i32
    return %c0_i32, %c0_i32_0 : i32, i32
  }
  func.func @transform_6(%arg0: i32) -> (i32, i32) {
    %c0_i32 = arith.constant 0 : i32
    %c0_i32_0 = arith.constant 0 : i32
    %c0_i32_1 = arith.constant 0 : i32
    return %c0_i32, %c0_i32_0 : i32, i32
  }
  func.func @transform_7(%arg0: i32) -> (i32, i32) {
    %c0_i32 = arith.constant 0 : i32
    %c0_i32_0 = arith.constant 0 : i32
    %c0_i32_1 = arith.constant 0 : i32
    return %c0_i32, %c0_i32_0 : i32, i32
  }
  func.func @transform_8(%arg0: i32) -> (i32, i32) {
    %c0_i32 = arith.constant 0 : i32
    %c0_i32_0 = arith.constant 0 : i32
    %c0_i32_1 = arith.constant 0 : i32
    return %c0_i32, %c0_i32_0 : i32, i32
  }
  func.func @transform_9(%arg0: i32) -> (i32, i32) {
    %c0_i32 = arith.constant 0 : i32
    %c0_i32_0 = arith.constant 0 : i32
    return %arg0, %c0_i32 : i32, i32
  }
}

</mosaic_0001>

<bundles_post_ra>
// kernel: tpu_custom_call.1
= control target key start
LH: loop header
LB: loop body
LE: loop exit
PB: predicated region body
PF: predicated region fallthrough
CT: control target
= control target key end

     0   :  { %s2650_s0 = inlined_call_operand.hbm [shape: f32[256,128], index: 0, kind: input, shape index: {}]   ;;  %s2651_s1 = inlined_call_operand.hbm [shape: bf16[128,256], index: 1, kind: input, shape index: {}]   ;;  %s2652_s2 = inlined_call_operand.vmem [shape: f32[1,256], index: 2, kind: input, shape index: {}]   ;;  %s2653_s3 = inlined_call_operand.hbm [shape: bf16[256,128], index: 3, kind: input, shape index: {}]   ;;  %s2654_s4 = inlined_call_operand.vmem [shape: f32[1,128], index: 4, kind: input, shape index: {}]   ;;  %s2655_s5 = inlined_call_operand.hbm [shape: bf16[128,128], index: 5, kind: input, shape index: {}]   ;;  %s2656_s6 = inlined_call_operand.vmem [shape: f32[1,128], index: 6, kind: input, shape index: {}]   ;;  %s2657_s7 = inlined_call_operand.hbm [shape: bf16[128,128], index: 7, kind: input, shape index: {}]   ;;  %s2658_s8 = inlined_call_operand.vmem [shape: f32[1,128], index: 8, kind: input, shape index: {}]   ;;  %s2659_s9 = inlined_call_operand.hbm [shape: bf16[256,128], index: 9, kind: output, shape index: {}]  }
   0x1   :  { %2667 = sst [smem:[#allocation18_spill]] %s2658_s8 }
   0x2   :  { %2668 = sst [smem:[#allocation19_spill]] %s2659_s9 }
   0x3   :  { %14 = vsyncpa [#allocation3], 0 }
   0x4   :  { %16 = vsyncpa [#allocation3 + $0x1], 0 }
   0x5   :  { %17 = vsyncpa [#allocation6], 0 }
   0x6   :  { %18 = vsyncpa [#allocation9], 0 }
   0x7   :  { %19 = vsyncpa [#allocation4], 0 }
   0x8   :  { %21 = vsyncpa [#allocation4 + $0x1], 0  ;;  %s2271_s30 = smov 0   ;;  %s2273_s10 = smov 0  }
   0x9   :  { %s2275_s11 = smov 0   ;;  %s2277_s12 = smov 0  }
   0xa LB: > { %2669 = sst [smem:[#allocation16_spill]] %s2194_s30  ;;  %s2292_s13 = sadd.s32 4294967295, %s2206_s12   ;;  %s2206_s12 = sphi %s2277_s12, %s2695_s12   ;;  %s2202_s11 = sphi %s2275_s11, %s2694_s11   ;;  %s2198_s10 = sphi %s2273_s10, %s2693_s10   ;;  %s2194_s30 = sphi %s2271_s30, %s2692_s30  }
   0xb   : > { %s1526_s14 = sadd.s32 4294967294, %s2206_s12   ;;  %p47_p0 = scmp.ne.s32.totalorder %s2198_s10, %s2194_s30 }
   0xc   : > { %p2660_p1 = scmp.eq.s32.totalorder %s2292_s13, 0  ;;  %p245_p3 = scmp.eq.s32.totalorder %s1526_s14, 1 }
   0xd   : > { %p1527_p5 = scmp.ge.s32.totalorder %s2206_s12, 1  ;;  %p252_p7 = scmp.lt.s32.totalorder %s2206_s12, 3 }
   0xe   : > { %p2301_p4 = por %p2660_p1, %p47_p0  ;;  %p2306_p6 = por %p245_p3, %p47_p0 }
   0xf   : > { %p2311_p8 = pnand %p1527_p5, %p252_p7  ;;  %s2208_s18 = smov [#allocation5]  }
  0x10   : > { %s2670_s15 = scalar_select %p2301_p4, 1, 0 }
  0x11   : > { %s2671_s16 = scalar_select %p2306_p6, 1, 0 }
  0x12   : > { %s2673_s17 = scalar_select %p2311_p8, 1, 0 }
  0x13   : > { %2672 = sst [smem:[#allocation17_spill]] %s2671_s16  ;;  %s264_s19 = sshll.u32 %s2208_s18, 4  ;;  %s265_s19 = int_to_ptr.vmem [resolvable:$true] %s264_s19 }
  0x14   : > { %p1860_p9 = pneg %p2311_p8  ;;  %s2209_s21 = smov [#allocation8]  }
  0x15   : > { %s296_s22 = sshll.u32 %s2209_s21, 4  ;;  %s1990_s25 = scalar_lea.hbm %s2651_s1, 2048  ;;  %s297_s22 = int_to_ptr.vmem [resolvable:$true] %s296_s22 }
  0x16   : > { %p2320_p11 = pnand %p1860_p9, %p2660_p1  ;;  %p1991_p12 = scmp.ne.s32.totalorder %s2651_s1, %s1990_s25 }
  0x17   : > { %p1997_p5 = scmp.lt.u32.totalorder %s1990_s25, %s2651_s1 }
  0x18   : > { %p2332_p13 = pneg %p2320_p11 }
  0x1a   : > { %p1993_p0 = pnand %p2332_p13, %p1991_p12 }
  0x1c   : > { %p1994_p3 = pneg %p1993_p0 }
  0x1e   : > { %p1999_p7 = pnand %p1997_p5, %p1994_p3 }
  0x20   : > { %2002 = shalt.err (!%p1999_p7)
}
  0x21   : > { %s2003_s18 = scalar_lea.vmem %s265_s19, 2048  ;;  %p2011_p2 = scmp.lt.s32.totalorder %s265_s19, %s265_s19 }
  0x22   : > { %p2004_p9 = scmp.ne.s32.totalorder %s265_s19, %s2003_s18  ;;  %p2012_p6 = scmp.lt.s32.totalorder %s2003_s18, %s2003_s18 }
  0x24   : > { %p2006_p10 = pnand %p2004_p9, %p2332_p13  ;;  %p2013_p4 = por %p2012_p6, %p2011_p2 }
  0x26   : > { %p2007_p1 = pneg %p2006_p10 }
  0x28   : > { %p2014_p8 = pnand %p2013_p4, %p2007_p1 }
  0x2a   : > { %2017 = shalt.err (!%p2014_p8)
}
  0x2b   : > { %s2666_s21 = smov 128   ;;  %s2211_s23 = smov 8  }
  0x2c   : > { %1863 = dma.hbm_to_vmem [thread:$0]  (!%p2320_p11), %s2651_s1, 2048, %s265_s19, [#allocation6], %s2666_s21, %s2666_s21, %s2211_s23  }
  0x2d   : > { %s2212_s26 = smov [#allocation7]   ;;  %s2018_s18 = scalar_lea.hbm %s2655_s5, 1024 }
  0x2e   : > { %s280_s27 = sshll.u32 %s2212_s26, 4  ;;  %p2019_p1 = scmp.ne.s32.totalorder %s2655_s5, %s2018_s18  ;;  %s281_s27 = int_to_ptr.vmem [resolvable:$true] %s280_s27 }
  0x2f   : > { %p2025_p6 = scmp.lt.u32.totalorder %s2018_s18, %s2655_s5 }
  0x30   : > { %p2021_p2 = pnand %p2019_p1, %p2332_p13 }
  0x32   : > { %p2022_p4 = pneg %p2021_p2 }
  0x34   : > { %p2027_p8 = pnand %p2025_p6, %p2022_p4 }
  0x36   : > { %2030 = shalt.err (!%p2027_p8)
}
  0x37   : > { %s2031_s19 = scalar_lea.vmem %s297_s22, 1024  ;;  %p2039_p3 = scmp.lt.s32.totalorder %s297_s22, %s297_s22 }
  0x38   : > { %p2032_p10 = scmp.ne.s32.totalorder %s297_s22, %s2031_s19  ;;  %p2040_p5 = scmp.lt.s32.totalorder %s2031_s19, %s2031_s19 }
  0x3a   : > { %p2034_p12 = pnand %p2032_p10, %p2332_p13  ;;  %p2041_p7 = por %p2040_p5, %p2039_p3 }
  0x3c   : > { %p2035_p0 = pneg %p2034_p12 }
  0x3e   : > { %p2042_p9 = pnand %p2041_p7, %p2035_p0 }
  0x40   : > { %2045 = shalt.err (!%p2042_p9)
}
  0x41   : > { %s2213_s30 = smov 64   ;;  %s2214_s16 = smov 4  }
  0x42   : > { %1869 = dma.hbm_to_vmem [thread:$0]  (!%p2320_p11), %s2655_s5, 1024, %s297_s22, [#allocation9], %s2213_s30, %s2213_s30, %s2214_s16  }
  0x43   : > { %s2046_s26 = scalar_lea.hbm %s2653_s3, 2048 }
  0x44   : > { %p2047_p1 = scmp.ne.s32.totalorder %s2653_s3, %s2046_s26  ;;  %p2053_p6 = scmp.lt.u32.totalorder %s2046_s26, %s2653_s3 }
  0x46   : > { %p2049_p2 = pnand %p2047_p1, %p2332_p13 }
  0x48   : > { %p2050_p4 = pneg %p2049_p2 }
  0x4a   : > { %p2055_p8 = pnand %p2053_p6, %p2050_p4 }
  0x4c   : > { %2058 = shalt.err (!%p2055_p8)
}
  0x4d   : > { %s2059_s8 = scalar_lea.vmem %s281_s27, 2048  ;;  %p2067_p3 = scmp.lt.s32.totalorder %s281_s27, %s281_s27 }
  0x4e   : > { %p2060_p10 = scmp.ne.s32.totalorder %s281_s27, %s2059_s8  ;;  %p2068_p5 = scmp.lt.s32.totalorder %s2059_s8, %s2059_s8 }
  0x50   : > { %p2062_p12 = pnand %p2060_p10, %p2332_p13  ;;  %p2069_p7 = por %p2068_p5, %p2067_p3 }
  0x52   : > { %p2063_p0 = pneg %p2062_p12 }
  0x54   : > { %p2070_p9 = pnand %p2069_p7, %p2063_p0 }
  0x56   : > { %2073 = shalt.err (!%p2070_p9)
}
  0x57   : > { %1866 = dma.hbm_to_vmem [thread:$0]  (!%p2320_p11), %s2653_s3, 2048, %s281_s27, [#allocation6], %s2213_s30, %s2213_s30, %s2214_s16  }
  0x58   : > { %s2215_s24 = smov [#allocation10]   ;;  %s2074_s14 = scalar_lea.hbm %s2657_s7, 1024 }
  0x59   : > { %s312_s25 = sshll.u32 %s2215_s24, 4  ;;  %p2075_p1 = scmp.ne.s32.totalorder %s2657_s7, %s2074_s14  ;;  %s313_s25 = int_to_ptr.vmem [resolvable:$true] %s312_s25 }
  0x5a   : > { %p2081_p6 = scmp.lt.u32.totalorder %s2074_s14, %s2657_s7 }
  0x5b   : > { %p2077_p2 = pnand %p2075_p1, %p2332_p13 }
  0x5d   : > { %p2078_p4 = pneg %p2077_p2 }
  0x5f   : > { %p2083_p8 = pnand %p2081_p6, %p2078_p4 }
  0x61   : > { %2086 = shalt.err (!%p2083_p8)
}
  0x62   : > { %s2087_s27 = scalar_lea.vmem %s313_s25, 1024  ;;  %p2095_p3 = scmp.lt.s32.totalorder %s313_s25, %s313_s25 }
  0x63   : > { %p2088_p10 = scmp.ne.s32.totalorder %s313_s25, %s2087_s27  ;;  %p2096_p5 = scmp.lt.s32.totalorder %s2087_s27, %s2087_s27 }
  0x65   : > { %p2090_p12 = pnand %p2088_p10, %p2332_p13  ;;  %p2097_p7 = por %p2096_p5, %p2095_p3 }
  0x67   : > { %p2091_p0 = pneg %p2090_p12 }
  0x69   : > { %p2098_p9 = pnand %p2097_p7, %p2091_p0 }
  0x6b   : > { %2101 = shalt.err (!%p2098_p9)
}
  0x6c   : > { %1872 = dma.hbm_to_vmem [thread:$0]  (!%p2320_p11), %s2657_s7, 1024, %s313_s25, [#allocation9], %s2213_s30, %s2213_s30, %s2214_s16  }
  0x6d   : > { %s2415_s28 = sadd.s32 1, %s2206_s12   ;;  %s34_s20 = sadd.s32 1, %s2202_s11 }
  0x6e   : > { %s31_s9 = ssub.s32 %s2206_s12, %s2415_s28  ;;  %p41_p13 = scmp.ne.s32.totalorder %s2202_s11, %s2198_s10 }
  0x6f   : > { %p32_p1 = scmp.eq.s32.totalorder %s31_s9, 0  ;;  %p42_p2 = scmp.eq.s32.totalorder %s2206_s12, 0 }
  0x70   : > { %p2676_p4 = scmp.eq.s32.totalorder %s2292_s13, 1  ;;  %p1885_p8 = scmp.lt.s32.totalorder %s2206_s12, 2 }
  0x71   : > { %s2431_s26 = scalar_select %p32_p1, %s2202_s11, %s34_s20  }
  0x72   : > { %p2425_p6 = por %p2676_p4, %p41_p13  ;;  %p43_p10 = por %p42_p2, %p41_p13 }
  0x73   : > { %s329_s29 = sand.u32 1, %s2202_s11   ;;  %s1615_s30 = sshll.u32 %s2206_s12, 11 }
  0x74   : > { %s1533_s14 = sshll.u32 %s329_s29, 7  ;;  %s2438_s18 = scalar_lea.hbm %s2650_s0, %s1615_s30 }
  0x75   : > { %s333_s19 = scalar_lea.vmem [#allocation2], %s1533_s14  ;;  %p2442_p11 = pnand %p1885_p8, %p43_p10 }
  0x76   : > { %s340_s8 = sshll.u32 %s333_s19, 4  ;;  %s2446_s21 = scalar_lea.sflag [#allocation3], %s329_s29  ;;  %s2440_s8 = int_to_ptr.vmem [resolvable:$true] %s340_s8 }
  0x77   : > { %s2102_s22 = scalar_lea.hbm %s2438_s18, 2048  ;;  %p2104_p0 = pneg %p2442_p11 }
  0x78   : > { %p2103_p12 = scmp.ne.s32.totalorder %s2438_s18, %s2102_s22  ;;  %s2107_s14 = scalar_lea.hbm %s2650_s0, 4096 }
  0x79   : > { %p2108_p7 = scmp.lt.u32.totalorder %s2438_s18, %s2650_s0  ;;  %p2109_p9 = scmp.lt.u32.totalorder %s2107_s14, %s2102_s22 }
  0x7a   : > { %p2105_p3 = pnand %p2104_p0, %p2103_p12  ;;  %p2111_p1 = scmp.lt.u32.totalorder %s2102_s22, %s2438_s18 }
  0x7b   : > { %p2110_p13 = por %p2109_p9, %p2108_p7 }
  0x7c   : > { %p2106_p5 = pneg %p2105_p3 }
  0x7d   : > { %p2112_p2 = por %p2111_p1, %p2110_p13 }
  0x7f   : > { %p2113_p4 = pnand %p2112_p2, %p2106_p5 }
  0x81   : > { %2116 = shalt.err (!%p2113_p4)
}
  0x82   : > { %s2117_s29 = scalar_lea.vmem %s2440_s8, 2048  ;;  %s2216_s25 = smov [#allocation2]  }
  0x83   : > { %p2118_p8 = scmp.ne.s32.totalorder %s2440_s8, %s2117_s29  ;;  %s2122_s19 = sshll.u32 %s2216_s25, 4  ;;  %s2123_s19 = int_to_ptr.vmem [resolvable:$false] %s2122_s19 }
  0x84   : > { %s2124_s20 = scalar_lea.vmem %s2123_s19, 4096  ;;  %p2125_p3 = scmp.lt.s32.totalorder %s2440_s8, %s2123_s19 }
  0x85   : > { %p2120_p10 = pnand %p2118_p8, %p2104_p0  ;;  %p2126_p7 = scmp.lt.s32.totalorder %s2124_s20, %s2117_s29 }
  0x87   : > { %p2121_p12 = pneg %p2120_p10  ;;  %p2127_p9 = por %p2126_p7, %p2125_p3 }
  0x89   : > { %p2128_p13 = pnand %p2127_p9, %p2121_p12 }
  0x8b   : > { %2131 = shalt.err (!%p2128_p13)
}
  0x8c   : > { %s2679_s22 = smov 128   ;;  %p2680_p0 = scmp.ne.s32.totalorder %s2673_s17, 0 }
  0x8d   : > { %1876 = dma.hbm_to_vmem [thread:$0]  (!%p2442_p11), %s2438_s18, 2048, %s2440_s8, %s2446_s21, %s2679_s22, %s2679_s22, %s2211_s23  }
  0x8e   : > { %352 = sbr.rel (%p2680_p0) target bundleno = 1147 (0x47b), region = 56  ;;  %s2480_s9 = sand.u32 (!%p2680_p0), 1, %s2198_s10  }
  0x8f   : > { %s1537_s14 = sshll.u32 (!%p2680_p0), %s2480_s9, 7  ;;  %s355_s30 = scalar_lea.sflag (!%p2680_p0), [#allocation3], %s2480_s9 }
  0x90   : > { %s2484_s16 = scalar_lea.vmem (!%p2680_p0), [#allocation2], %s1537_s14  ;;  %p2681_p5 = scmp.ne.s32.totalorder (!%p2680_p0), %s2670_s15, 0 }
  0x95   : > { %2177 = dma.done.wait (%p2681_p5), %s355_s30, 2048  }
  0x96   : > { %2179 = vsyncadd (%p2681_p5), %s355_s30, 4294965248  ;;  %p2682_p11 = scmp.eq.s32.totalorder %s2292_s13, 0 }
  0x98   : > { %2181 = dma.done.wait (%p2682_p11), [#allocation6], 4096   ;;  %p2683_p1 = pmov %p2682_p11 }
  0x9a   : > { %2183 = vsyncadd (%p2683_p1), [#allocation6], 4294963200  ;;  %p2684_p2 = pmov %p2683_p1 }
  0x9b   : > { %p2685_p4 = pmov %p2683_p1 }
  0x9c   : > { %2185 = dma.done.wait (%p2684_p2), [#allocation9], 2048  }
  0x9d   : > { %2187 = vsyncadd (%p2685_p4), [#allocation9], 4294965248  ;;  %v2217_v0 = vmov 0   ;;  %v1934_v1 = vld [vmem:[#allocation5 + $0x4] ss:$8 sps:$4 sm:$0xff]   ;;  %v1962_v18 = vld [vmem:[#allocation7 + $0x50] sm:$0xff]   ;;  %v454_v60 = vlaneseq }
  0x9e   : > { %576 = vmatprep.mubr.bf16.mxu0 %v2217_v0  ;;  %v1936_v2 = vld [vmem:[#allocation5] ss:$8 sps:$4 sm:$0xff]   ;;  %544 = vmatprep.subr.bf16.mxu0 %v1934_v1  ;;  %v1937_v3 = vld [vmem:[#allocation5 + $0x14] ss:$8 sps:$4 sm:$0xff]   ;;  %v1939_v4 = vld [vmem:[#allocation5 + $0x10] ss:$8 sps:$4 sm:$0xff]  }
  0x9f   : > { %545 = vmatpush1.bf16.msra.mxu0 %v1936_v2  ;;  %v1940_v5 = vld [vmem:[#allocation5 + $0x24] ss:$8 sps:$4 sm:$0xff]   ;;  %v1942_v6 = vld [vmem:[#allocation5 + $0x20] ss:$8 sps:$4 sm:$0xff]   ;;  %v1943_v7 = vld [vmem:[#allocation5 + $0x34] ss:$8 sps:$4 sm:$0xff]  }
  0xa0   : > { %546 = vmatprep.subr.bf16.mxu0 %v1937_v3  ;;  %v1945_v8 = vld [vmem:[#allocation5 + $0x30] ss:$8 sps:$4 sm:$0xff]   ;;  %v1946_v9 = vld [vmem:[#allocation5 + $0x44] ss:$8 sps:$4 sm:$0xff]   ;;  %v1948_v10 = vld [vmem:[#allocation5 + $0x40] ss:$8 sps:$4 sm:$0xff]  }
  0xa1   : > { %v1949_v11 = vld [vmem:[#allocation5 + $0x54] ss:$8 sps:$4 sm:$0xff]   ;;  %v1958_v12 = vld [vmem:[#allocation7 + $0x40] sm:$0xff]   ;;  %v1951_v13 = vld [vmem:[#allocation5 + $0x50] ss:$8 sps:$4 sm:$0xff]   ;;  %v455_v61 = vshrl.u32 %v454_v60, 7 }
  0xa2   : > { %v1959_v14 = vld [vmem:[#allocation7] sm:$0xff]   ;;  %1680 = vmatprep.subr.bf16.mxu1 %v1958_v12  ;;  %v1960_v16 = vld [vmem:[#allocation7 + $0x48] sm:$0xff]   ;;  %v1955_v20 = vld [vmem:[#allocation5 + $0x74] ss:$8 sps:$4 sm:$0xff]   ;;  %s2686_s25 = sld [smem:[#allocation18_spill]]  ;;  %s1542_s19 = sshll.u32 %s2480_s9, 6 }
  0xa3   : > { %547 = vmatpush1.bf16.msra.mxu0 %v1939_v4  ;;  %v1952_v15 = vld [vmem:[#allocation5 + $0x64] ss:$8 sps:$4 sm:$0xff]   ;;  %1681 = vmatpush3.bf16.msra.mxu1 %v1959_v14  ;;  %v1954_v19 = vld [vmem:[#allocation5 + $0x60] ss:$8 sps:$4 sm:$0xff]   ;;  %v1963_v21 = vld [vmem:[#allocation7 + $0x10] sm:$0xff]   ;;  %v456_v62 = vsub.s32 0, %v455_v61 }
  0xa4   : > { %548 = vmatprep.subr.bf16.mxu0 %v1940_v5  ;;  %v1961_v17 = vld [vmem:[#allocation7 + $0x8] sm:$0xff]   ;;  %1682 = vmatprep.subr.bf16.mxu1 %v1960_v16  ;;  %v1964_v22 = vld [vmem:[#allocation7 + $0x58] sm:$0xff]   ;;  %v412_v24 = vld [vmem:[%s2484_s16] sm:$0xff]  ;;  %s2589_s20 = scalar_lea.vmem [#allocation11], %s1542_s19  ;;  %s1632_s14 = sshll.u32 %s2292_s13, 10 }
  0xa5   : > { %v1957_v23 = vld [vmem:[#allocation5 + $0x70] ss:$8 sps:$4 sm:$0xff]   ;;  %v413_v25 = vld [vmem:[%s2484_s16 + $0x8] sm:$0xff]  ;;  %v1966_v27 = vld [vmem:[#allocation7 + $0x60] sm:$0xff]   ;;  %s1415_s22 = sshll.u32 %s2589_s20, 4  ;;  %s2687_s15 = sld [smem:[#allocation19_spill]]  ;;  %s2599_s22 = int_to_ptr.vmem [resolvable:$true] %s1415_s22 }
  0xa6   : > { %v1965_v26 = vld [vmem:[#allocation7 + $0x18] sm:$0xff]   ;;  %v1967_v28 = vld [vmem:[#allocation7 + $0x20] sm:$0xff]   ;;  %v428_v29 = vpack.c.bf16 %v413_v25, %v412_v24  ;;  %v1968_v30 = vld [vmem:[#allocation7 + $0x68] sm:$0xff]   ;;  %s1402_s13 = scalar_lea.sflag [#allocation4], %s2480_s9  ;;  %s2132_s23 = scalar_lea.vmem %s2599_s22, 1024 }
  0xa7   : > { %549 = vmatpush1.bf16.msra.mxu0 %v1942_v6  ;;  %1683 = vmatpush3.bf16.msra.mxu1 %v1961_v17  ;;  %v414_v31 = vld [vmem:[%s2484_s16 + $0x10] sm:$0xff]  ;;  %v415_v32 = vld [vmem:[%s2484_s16 + $0x18] sm:$0xff]  ;;  %v416_v34 = vld [vmem:[%s2484_s16 + $0x20] sm:$0xff]  ;;  %p2133_p8 = scmp.ne.s32.totalorder %s2599_s22, %s2132_s23  ;;  %s2218_s18 = smov [#allocation11]  }
  0xa8   : > { %550 = vmatprep.subr.bf16.mxu0 %v1943_v7  ;;  %1684 = vmatprep.subr.bf16.mxu1 %v1962_v18  ;;  %v429_v33 = vpack.c.bf16 %v415_v32, %v414_v31  ;;  %v417_v35 = vld [vmem:[%s2484_s16 + $0x28] sm:$0xff]  ;;  %v418_v37 = vld [vmem:[%s2484_s16 + $0x30] sm:$0xff]  ;;  %v419_v38 = vld [vmem:[%s2484_s16 + $0x38] sm:$0xff]  ;;  %s2136_s8 = sshll.u32 %s2218_s18, 4  ;;  %s2137_s8 = int_to_ptr.vmem [resolvable:$false] %s2136_s8 }
  0xa9   : > { %v430_v36 = vpack.c.bf16 %v417_v35, %v416_v34  ;;  %v431_v39 = vpack.c.bf16 %v419_v38, %v418_v37  ;;  %v420_v40 = vld [vmem:[%s2484_s16 + $0x40] sm:$0xff]  ;;  %v421_v41 = vld [vmem:[%s2484_s16 + $0x48] sm:$0xff]  ;;  %v422_v43 = vld [vmem:[%s2484_s16 + $0x50] sm:$0xff]  ;;  %p2134_p10 = pnand %p2133_p8, %p2425_p6  ;;  %s2138_s27 = scalar_lea.vmem %s2137_s8, 2048 }
  0xaa   : > { %v432_v42 = vpack.c.bf16 %v421_v41, %v420_v40  ;;  %v423_v44 = vld [vmem:[%s2484_s16 + $0x58] sm:$0xff]  ;;  %v424_v46 = vld [vmem:[%s2484_s16 + $0x60] sm:$0xff]  ;;  %v425_v47 = vld [vmem:[%s2484_s16 + $0x68] sm:$0xff]  ;;  %p2139_p3 = scmp.lt.s32.totalorder %s2599_s22, %s2137_s8  ;;  %p2140_p7 = scmp.lt.s32.totalorder %s2138_s27, %s2132_s23 }
  0xab   : > { %551 = vmatpush1.bf16.msra.mxu0 %v1945_v8  ;;  %1685 = vmatpush3.bf16.msra.mxu1 %v1963_v21  ;;  %v433_v45 = vpack.c.bf16 %v423_v44, %v422_v43  ;;  %v434_v48 = vpack.c.bf16 %v425_v47, %v424_v46  ;;  %v426_v49 = vld [vmem:[%s2484_s16 + $0x70] sm:$0xff]  ;;  %v427_v50 = vld [vmem:[%s2484_s16 + $0x78] sm:$0xff]  ;;  %v1969_v52 = vld [vmem:[#allocation7 + $0x28] sm:$0xff]   ;;  %s2604_s17 = scalar_lea.hbm %s2687_s15, %s1632_s14  ;;  %p2135_p12 = pneg %p2134_p10 }
  0xac   : > { %552 = vmatprep.subr.bf16.mxu0 %v1946_v9  ;;  %1686 = vmatprep.subr.bf16.mxu1 %v1964_v22  ;;  %v435_v51 = vpack.c.bf16 %v427_v50, %v426_v49  ;;  %v1970_v53 = vld [vmem:[#allocation7 + $0x70] sm:$0xff]   ;;  %v1972_v55 = vld [vmem:[#allocation7 + $0x78] sm:$0xff]   ;;  %v1974_v57 = vld [vmem:[#allocation8] sm:$0xff]   ;;  %p2141_p9 = por %p2140_p7, %p2139_p3 }
  0xad   : > { %v1971_v54 = vld [vmem:[#allocation7 + $0x30] sm:$0xff]   ;;  %v1973_v56 = vld [vmem:[#allocation7 + $0x38] sm:$0xff]   ;;  %v1975_v58 = vld [vmem:[#allocation8 + $0x8] sm:$0xff]  }
  0xae   : > { %v1976_v59 = vld [vmem:[#allocation8 + $0x10] sm:$0xff]   ;;  %v452_v63 = vld [vmem:[%s2652_s2] sm:$0x3]  ;;  %p2142_p13 = pnand %p2141_p9, %p2135_p12 }
  0xaf   : > { %553 = vmatpush1.bf16.msra.mxu0 %v1948_v10  ;;  %1687 = vmatpush3.bf16.msra.mxu1 %v1965_v26  ;;  %v2525_v1 = vrot.slane %v452_v63, %v456_v62 }
  0xb0   : > { %554 = vmatprep.subr.bf16.mxu0 %v1949_v11  ;;  %1688 = vmatprep.subr.bf16.mxu1 %v1966_v27 }
  0xb3   : > { %555 = vmatpush1.bf16.msra.mxu0 %v1951_v13  ;;  %1689 = vmatpush3.bf16.msra.mxu1 %v1967_v28 }
  0xb4   : > { %556 = vmatprep.subr.bf16.mxu0 %v1952_v15  ;;  %1690 = vmatprep.subr.bf16.mxu1 %v1968_v30 }
  0xb7   : > { %557 = vmatpush1.bf16.msra.mxu0 %v1954_v19  ;;  %1691 = vmatpush3.bf16.msra.mxu1 %v1969_v52 }
  0xb8   : > { %558 = vmatprep.subr.bf16.mxu0 %v1955_v20  ;;  %1692 = vmatprep.subr.bf16.mxu1 %v1970_v53 }
  0xbb   : > { %559 = vmatpush1.bf16.msra.mxu0 %v1957_v23  ;;  %1693 = vmatpush3.bf16.msra.mxu1 %v1971_v54 }
  0xbc   : > { %1694 = vmatprep.subr.bf16.mxu1 %v1972_v55  ;;  %1776 = vmatprep.subr.bf16.mxu0 %v1974_v57 }
  0xbe   : > { %577 = vmatmul.mubr.bf16.vlgmr.msra.gmra.mrb[0].mxu0 %v428_v29 }
  0xbf   : > { %586 = vmatprep.mubr.bf16.mxu0 %v2217_v0  ;;  %1695 = vmatpush3.bf16.msra.mxu1 %v1973_v56 }
  0xc0   : > { %1777 = vmatpush3.bf16.msra.mxu0 %v1974_v57 }
  0xc1   : > { %1778 = vmatprep.subr.bf16.mxu0 %v1975_v58 }
  0xc4   : > { %1779 = vmatpush3.bf16.msra.mxu0 %v1975_v58 }
  0xc5   : > { %1780 = vmatprep.subr.bf16.mxu0 %v1976_v59 }
  0xc6   : > { %587 = vmatmul.mubr.bf16.gmra.mrb[4].mxu0 %v429_v33 }
  0xc7   : > { %596 = vmatprep.mubr.bf16.mxu0 %v2217_v0 }
  0xc8   : > { %1781 = vmatpush3.bf16.msra.mxu0 %v1976_v59 }
  0xce   : > { %597 = vmatmul.mubr.bf16.gmra.mrb[8].mxu0 %v430_v36 }
  0xcf   : > { %606 = vmatprep.mubr.bf16.mxu0 %v2217_v0 }
  0xd6   : > { %607 = vmatmul.mubr.bf16.gmra.mrb[12].mxu0 %v431_v39 }
  0xd7   : > { %616 = vmatprep.mubr.bf16.mxu0 %v2217_v0 }
  0xde   : > { %617 = vmatmul.mubr.bf16.gmra.mrb[16].mxu0 %v432_v42 }
  0xdf   : > { %626 = vmatprep.mubr.bf16.mxu0 %v2217_v0 }
  0xe6   : > { %627 = vmatmul.mubr.bf16.gmra.mrb[20].mxu0 %v433_v45 }
  0xe7   : > { %636 = vmatprep.mubr.bf16.mxu0 %v2217_v0 }
  0xee   : > { %637 = vmatmul.mubr.bf16.gmra.mrb[24].mxu0 %v434_v48 }
  0xef   : > { %646 = vmatprep.mubr.bf16.mxu0 %v2217_v0  ;;  %v460_v0 = vsub.s32 1, %v455_v61 }
  0xf1   : > { %v2527_v2 = vrot.slane %v452_v63, %v460_v0 }
  0xf6   : > { %647 = vmatmul.mubr.bf16.gmra.mrb[28].mxu0 %v435_v51 }
 0x191   : > { %v578_v3 = vpop.f32.mrb[0].mxu0 }
 0x192   : > { %v579_v4 = vadd.f32 %v578_v3, %v2525_v1  ;;  %v580_v5 = vpop.f32.mrb[1].mxu0 }
 0x193   : > { %v581_v6 = vadd.f32 %v580_v5, %v2527_v2  ;;  %v582_v7 = vpop.f32.mrb[2].mxu0 }
 0x194   : > { %v583_v8 = vadd.f32 %v582_v7, %v2525_v1  ;;  %v584_v9 = vpop.f32.mrb[3].mxu0  ;;  %v657_v11 = vmax.f32 %v579_v4, 0.0 }
 0x195   : > { %v585_v10 = vadd.f32 %v584_v9, %v2527_v2  ;;  %v658_v13 = vmax.f32 %v581_v6, 0.0 }
 0x196   : > { %v659_v12 = vmax.f32 %v583_v8, 0.0 }
 0x197   : > { %v660_v14 = vmax.f32 %v585_v10, 0.0 }
 0x198   : > { %v689_v15 = vpack.c.bf16 %v659_v12, %v657_v11 }
 0x199   : > { %v588_v16 = vpop.f32.mrb[4].mxu0  ;;  %v690_v17 = vpack.c.bf16 %v660_v14, %v658_v13 }
 0x19a   : > { %v589_v18 = vadd.f32 %v588_v16, %v2525_v1  ;;  %v590_v19 = vpop.f32.mrb[5].mxu0 }
 0x19b   : > { %v591_v20 = vadd.f32 %v590_v19, %v2527_v2  ;;  %v592_v21 = vpop.f32.mrb[6].mxu0  ;;  %872 = vmatprep.mubr.bf16.mxu1 %v690_v17 }
 0x19c   : > { %v593_v22 = vadd.f32 %v592_v21, %v2525_v1  ;;  %v594_v23 = vpop.f32.mrb[7].mxu0  ;;  %873 = vmatmul.mubr.bf16.vlgmr.msra.gmra.mrb[0].mxu1 %v689_v15  ;;  %v661_v25 = vmax.f32 %v589_v18, 0.0 }
 0x19d   : > { %v595_v24 = vadd.f32 %v594_v23, %v2527_v2  ;;  %v662_v27 = vmax.f32 %v591_v20, 0.0 }
 0x19e   : > { %v663_v26 = vmax.f32 %v593_v22, 0.0 }
 0x19f   : > { %v664_v28 = vmax.f32 %v595_v24, 0.0 }
 0x1a0   : > { %v691_v29 = vpack.c.bf16 %v663_v26, %v661_v25 }
 0x1a1   : > { %v692_v30 = vpack.c.bf16 %v664_v28, %v662_v27  ;;  %v598_v31 = vpop.f32.mrb[8].mxu0 }
 0x1a2   : > { %v599_v32 = vadd.f32 %v598_v31, %v2525_v1  ;;  %v600_v33 = vpop.f32.mrb[9].mxu0 }
 0x1a3   : > { %v601_v34 = vadd.f32 %v600_v33, %v2527_v2  ;;  %v602_v35 = vpop.f32.mrb[10].mxu0  ;;  %880 = vmatprep.mubr.bf16.mxu1 %v692_v30 }
 0x1a4   : > { %v603_v36 = vadd.f32 %v602_v35, %v2525_v1  ;;  %v604_v37 = vpop.f32.mrb[11].mxu0  ;;  %881 = vmatmul.mubr.bf16.gmra.mrb[4].mxu1 %v691_v29  ;;  %v665_v39 = vmax.f32 %v599_v32, 0.0 }
 0x1a5   : > { %v605_v38 = vadd.f32 %v604_v37, %v2527_v2  ;;  %v666_v41 = vmax.f32 %v601_v34, 0.0 }
 0x1a6   : > { %v667_v40 = vmax.f32 %v603_v36, 0.0 }
 0x1a7   : > { %v668_v42 = vmax.f32 %v605_v38, 0.0 }
 0x1a8   : > { %v693_v43 = vpack.c.bf16 %v667_v40, %v665_v39 }
 0x1a9   : > { %v694_v44 = vpack.c.bf16 %v668_v42, %v666_v41  ;;  %v608_v45 = vpop.f32.mrb[12].mxu0 }
 0x1aa   : > { %v609_v46 = vadd.f32 %v608_v45, %v2525_v1  ;;  %v610_v47 = vpop.f32.mrb[13].mxu0 }
 0x1ab   : > { %v611_v48 = vadd.f32 %v610_v47, %v2527_v2  ;;  %v612_v49 = vpop.f32.mrb[14].mxu0  ;;  %888 = vmatprep.mubr.bf16.mxu1 %v694_v44 }
 0x1ac   : > { %v613_v50 = vadd.f32 %v612_v49, %v2525_v1  ;;  %v614_v51 = vpop.f32.mrb[15].mxu0  ;;  %889 = vmatmul.mubr.bf16.gmra.mrb[8].mxu1 %v693_v43  ;;  %v669_v53 = vmax.f32 %v609_v46, 0.0 }
 0x1ad   : > { %v615_v52 = vadd.f32 %v614_v51, %v2527_v2  ;;  %v670_v55 = vmax.f32 %v611_v48, 0.0 }
 0x1ae   : > { %v671_v54 = vmax.f32 %v613_v50, 0.0 }
 0x1af   : > { %v672_v56 = vmax.f32 %v615_v52, 0.0 }
 0x1b0   : > { %v695_v57 = vpack.c.bf16 %v671_v54, %v669_v53  ;;  %v1977_v53 = vld [vmem:[#allocation8 + $0x18] sm:$0xff]   ;;  %v1978_v54 = vld [vmem:[#allocation8 + $0x20] sm:$0xff]  }
 0x1b1   : > { %v696_v58 = vpack.c.bf16 %v672_v56, %v670_v55  ;;  %v618_v59 = vpop.f32.mrb[16].mxu0  ;;  %1782 = vmatprep.subr.bf16.mxu0 %v1977_v53  ;;  %v1979_v55 = vld [vmem:[#allocation8 + $0x28] sm:$0xff]   ;;  %v1982_v56 = vld [vmem:[#allocation10] sm:$0xff]  }
 0x1b2   : > { %v619_v60 = vadd.f32 %v618_v59, %v2525_v1  ;;  %v620_v61 = vpop.f32.mrb[17].mxu0  ;;  %1783 = vmatpush3.bf16.msra.mxu0 %v1977_v53  ;;  %1808 = vmatprep.subr.bf16.mxu1 %v1982_v56  ;;  %v1985_v59 = vld [vmem:[#allocation10 + $0x18] sm:$0xff]  }
 0x1b3   : > { %v621_v62 = vadd.f32 %v620_v61, %v2527_v2  ;;  %v622_v63 = vpop.f32.mrb[18].mxu0  ;;  %896 = vmatprep.mubr.bf16.mxu1 %v696_v58  ;;  %1784 = vmatprep.subr.bf16.mxu0 %v1978_v54  ;;  %v1984_v58 = vld [vmem:[#allocation10 + $0x10] sm:$0xff]   ;;  %v1987_v61 = vld [vmem:[#allocation10 + $0x28] sm:$0xff]  }
 0x1b4   : > { %v623_v0 = vadd.f32 %v622_v63, %v2525_v1  ;;  %v624_v3 = vpop.f32.mrb[19].mxu0  ;;  %897 = vmatmul.mubr.bf16.gmra.mrb[12].mxu1 %v695_v57  ;;  %v673_v5 = vmax.f32 %v619_v60, 0.0  ;;  %v1983_v57 = vld [vmem:[#allocation10 + $0x8] sm:$0xff]   ;;  %v1986_v60 = vld [vmem:[#allocation10 + $0x20] sm:$0xff]  }
 0x1b5   : > { %v625_v4 = vadd.f32 %v624_v3, %v2527_v2  ;;  %v674_v7 = vmax.f32 %v621_v62, 0.0  ;;  %1809 = vmatpush3.bf16.msra.mxu1 %v1982_v56  ;;  %v2564_v63 = vld [vmem:[%s2654_s4] ss:$0 sm:$0xff] }
 0x1b6   : > { %v675_v6 = vmax.f32 %v623_v0, 0.0  ;;  %1785 = vmatpush3.bf16.msra.mxu0 %v1978_v54  ;;  %1810 = vmatprep.subr.bf16.mxu1 %v1983_v57 }
 0x1b7   : > { %v676_v8 = vmax.f32 %v625_v4, 0.0  ;;  %1786 = vmatprep.subr.bf16.mxu0 %v1979_v55 }
 0x1b8   : > { %v697_v9 = vpack.c.bf16 %v675_v6, %v673_v5 }
 0x1b9   : > { %v698_v10 = vpack.c.bf16 %v676_v8, %v674_v7  ;;  %v628_v11 = vpop.f32.mrb[20].mxu0  ;;  %1811 = vmatpush3.bf16.msra.mxu1 %v1983_v57 }
 0x1ba   : > { %v629_v12 = vadd.f32 %v628_v11, %v2525_v1  ;;  %v630_v13 = vpop.f32.mrb[21].mxu0  ;;  %1787 = vmatpush3.bf16.msra.mxu0 %v1979_v55  ;;  %1812 = vmatprep.subr.bf16.mxu1 %v1984_v58 }
 0x1bb   : > { %v631_v14 = vadd.f32 %v630_v13, %v2527_v2  ;;  %v632_v15 = vpop.f32.mrb[22].mxu0  ;;  %904 = vmatprep.mubr.bf16.mxu1 %v698_v10 }
 0x1bc   : > { %v633_v16 = vadd.f32 %v632_v15, %v2525_v1  ;;  %v634_v17 = vpop.f32.mrb[23].mxu0  ;;  %905 = vmatmul.mubr.bf16.gmra.mrb[16].mxu1 %v697_v9  ;;  %v677_v19 = vmax.f32 %v629_v12, 0.0 }
 0x1bd   : > { %v635_v18 = vadd.f32 %v634_v17, %v2527_v2  ;;  %v678_v21 = vmax.f32 %v631_v14, 0.0  ;;  %1813 = vmatpush3.bf16.msra.mxu1 %v1984_v58 }
 0x1be   : > { %v679_v20 = vmax.f32 %v633_v16, 0.0  ;;  %1814 = vmatprep.subr.bf16.mxu1 %v1985_v59 }
 0x1bf   : > { %v680_v22 = vmax.f32 %v635_v18, 0.0 }
 0x1c0   : > { %v699_v23 = vpack.c.bf16 %v679_v20, %v677_v19 }
 0x1c1   : > { %v700_v24 = vpack.c.bf16 %v680_v22, %v678_v21  ;;  %v638_v25 = vpop.f32.mrb[24].mxu0  ;;  %1815 = vmatpush3.bf16.msra.mxu1 %v1985_v59 }
 0x1c2   : > { %v639_v26 = vadd.f32 %v638_v25, %v2525_v1  ;;  %v640_v27 = vpop.f32.mrb[25].mxu0  ;;  %1816 = vmatprep.subr.bf16.mxu1 %v1986_v60 }
 0x1c3   : > { %v641_v28 = vadd.f32 %v640_v27, %v2527_v2  ;;  %v642_v29 = vpop.f32.mrb[26].mxu0  ;;  %912 = vmatprep.mubr.bf16.mxu1 %v700_v24 }
 0x1c4   : > { %v643_v30 = vadd.f32 %v642_v29, %v2525_v1  ;;  %v644_v31 = vpop.f32.mrb[27].mxu0  ;;  %913 = vmatmul.mubr.bf16.gmra.mrb[20].mxu1 %v699_v23  ;;  %v681_v33 = vmax.f32 %v639_v26, 0.0 }
 0x1c5   : > { %v645_v32 = vadd.f32 %v644_v31, %v2527_v2  ;;  %v682_v35 = vmax.f32 %v641_v28, 0.0  ;;  %1817 = vmatpush3.bf16.msra.mxu1 %v1986_v60 }
 0x1c6   : > { %v683_v34 = vmax.f32 %v643_v30, 0.0  ;;  %1818 = vmatprep.subr.bf16.mxu1 %v1987_v61 }
 0x1c7   : > { %v684_v36 = vmax.f32 %v645_v32, 0.0 }
 0x1c8   : > { %v701_v37 = vpack.c.bf16 %v683_v34, %v681_v33 }
 0x1c9   : > { %v702_v38 = vpack.c.bf16 %v684_v36, %v682_v35  ;;  %v648_v39 = vpop.f32.mrb[28].mxu0  ;;  %1819 = vmatpush3.bf16.msra.mxu1 %v1987_v61 }
 0x1ca   : > { %v649_v40 = vadd.f32 %v648_v39, %v2525_v1  ;;  %v650_v41 = vpop.f32.mrb[29].mxu0 }
 0x1cb   : > { %v651_v42 = vadd.f32 %v650_v41, %v2527_v2  ;;  %v652_v43 = vpop.f32.mrb[30].mxu0  ;;  %920 = vmatprep.mubr.bf16.mxu1 %v702_v38 }
 0x1cc   : > { %v653_v44 = vadd.f32 %v652_v43, %v2525_v1  ;;  %v654_v45 = vpop.f32.mrb[31].mxu0  ;;  %921 = vmatmul.mubr.bf16.gmra.mrb[24].mxu1 %v701_v37  ;;  %v685_v47 = vmax.f32 %v649_v40, 0.0  ;;  %v1980_v1 = vld [vmem:[#allocation8 + $0x30] sm:$0xff]  }
 0x1cd   : > { %v655_v46 = vadd.f32 %v654_v45, %v2527_v2  ;;  %v686_v49 = vmax.f32 %v651_v42, 0.0  ;;  %1788 = vmatprep.subr.bf16.mxu0 %v1980_v1  ;;  %v1981_v2 = vld [vmem:[#allocation8 + $0x38] sm:$0xff]  }
 0x1ce   : > { %v687_v48 = vmax.f32 %v653_v44, 0.0  ;;  %1789 = vmatpush3.bf16.msra.mxu0 %v1980_v1 }
 0x1cf   : > { %v688_v50 = vmax.f32 %v655_v46, 0.0  ;;  %1790 = vmatprep.subr.bf16.mxu0 %v1981_v2 }
 0x1d0   : > { %v703_v51 = vpack.c.bf16 %v687_v48, %v685_v47 }
 0x1d1   : > { %v704_v52 = vpack.c.bf16 %v688_v50, %v686_v49 }
 0x1d2   : > { %1791 = vmatpush3.bf16.msra.mxu0 %v1981_v2 }
 0x1d3   : > { %928 = vmatprep.mubr.bf16.mxu1 %v704_v52 }
 0x1d4   : > { %929 = vmatmul.mubr.bf16.gmra.mrb[28].mxu1 %v703_v51 }
 0x26f   : > { %v1696_v62 = vpop.f32.mrb[0].mxu1 }
 0x270   : > { %v1697_v0 = vpop.f32.mrb[1].mxu1 }
 0x271   : > { %v1698_v3 = vadd.f32 %v1697_v0, %v1696_v62  ;;  %v1699_v4 = vpop.f32.mrb[2].mxu1 }
 0x272   : > { %v1700_v5 = vpop.f32.mrb[3].mxu1 }
 0x273   : > { %v875_v6 = vadd.f32 %v1698_v3, %v2564_v63  ;;  %v1701_v7 = vadd.f32 %v1700_v5, %v1699_v4 }
 0x275   : > { %v878_v8 = vadd.f32 %v1701_v7, %v2564_v63  ;;  %v937_v9 = vmax.f32 %v875_v6, 0.0 }
 0x277   : > { %v938_v10 = vmax.f32 %v878_v8, 0.0  ;;  %v1702_v11 = vpop.f32.mrb[4].mxu1 }
 0x278   : > { %v1703_v12 = vpop.f32.mrb[5].mxu1 }
 0x279   : > { %v1704_v13 = vadd.f32 %v1703_v12, %v1702_v11  ;;  %v1705_v14 = vpop.f32.mrb[6].mxu1  ;;  %v953_v15 = vpack.c.bf16 %v938_v10, %v937_v9 }
 0x27a   : > { %v1706_v16 = vpop.f32.mrb[7].mxu1 }
 0x27b   : > { %v883_v17 = vadd.f32 %v1704_v13, %v2564_v63  ;;  %v1707_v18 = vadd.f32 %v1706_v16, %v1705_v14  ;;  %1792 = vmatprep.mubr.bf16.mxu0 %v953_v15 }
 0x27d   : > { %v886_v19 = vadd.f32 %v1707_v18, %v2564_v63  ;;  %v939_v20 = vmax.f32 %v883_v17, 0.0 }
 0x27f   : > { %v940_v21 = vmax.f32 %v886_v19, 0.0  ;;  %v1708_v22 = vpop.f32.mrb[8].mxu1 }
 0x280   : > { %v1709_v23 = vpop.f32.mrb[9].mxu1 }
 0x281   : > { %v954_v24 = vpack.c.bf16 %v940_v21, %v939_v20  ;;  %v1710_v25 = vadd.f32 %v1709_v23, %v1708_v22  ;;  %v1711_v26 = vpop.f32.mrb[10].mxu1 }
 0x282   : > { %v1712_v27 = vpop.f32.mrb[11].mxu1 }
 0x283   : > { %v891_v28 = vadd.f32 %v1710_v25, %v2564_v63  ;;  %v1713_v29 = vadd.f32 %v1712_v27, %v1711_v26  ;;  %1793 = vmatmul.mubr.bf16.vlgmr.msra.gmra.mrb[32].mxu0 %v954_v24  ;;  %v1988_v26 = vld [vmem:[#allocation10 + $0x30] sm:$0xff]   ;;  %v1989_v27 = vld [vmem:[#allocation10 + $0x38] sm:$0xff]  }
 0x284   : > { %1820 = vmatprep.subr.bf16.mxu1 %v1988_v26 }
 0x285   : > { %v894_v30 = vadd.f32 %v1713_v29, %v2564_v63  ;;  %v941_v31 = vmax.f32 %v891_v28, 0.0  ;;  %1821 = vmatpush3.bf16.msra.mxu1 %v1988_v26  ;;  %v1576_v28 = vld [vmem:[%s2656_s6] ss:$0 sm:$0xff] }
 0x286   : > { %1822 = vmatprep.subr.bf16.mxu1 %v1989_v27 }
 0x287   : > { %v942_v32 = vmax.f32 %v894_v30, 0.0  ;;  %v1714_v33 = vpop.f32.mrb[12].mxu1 }
 0x288   : > { %v1715_v34 = vpop.f32.mrb[13].mxu1 }
 0x289   : > { %v1716_v35 = vadd.f32 %v1715_v34, %v1714_v33  ;;  %v1717_v36 = vpop.f32.mrb[14].mxu1  ;;  %v955_v37 = vpack.c.bf16 %v942_v32, %v941_v31  ;;  %1823 = vmatpush3.bf16.msra.mxu1 %v1989_v27 }
 0x28a   : > { %v1718_v38 = vpop.f32.mrb[15].mxu1 }
 0x28b   : > { %v899_v39 = vadd.f32 %v1716_v35, %v2564_v63  ;;  %v1719_v40 = vadd.f32 %v1718_v38, %v1717_v36  ;;  %1796 = vmatprep.mubr.bf16.mxu0 %v955_v37 }
 0x28d   : > { %v902_v41 = vadd.f32 %v1719_v40, %v2564_v63  ;;  %v943_v42 = vmax.f32 %v899_v39, 0.0 }
 0x28f   : > { %v944_v43 = vmax.f32 %v902_v41, 0.0  ;;  %v1720_v44 = vpop.f32.mrb[16].mxu1 }
 0x290   : > { %v1721_v45 = vpop.f32.mrb[17].mxu1 }
 0x291   : > { %v1722_v46 = vadd.f32 %v1721_v45, %v1720_v44  ;;  %v1723_v47 = vpop.f32.mrb[18].mxu1  ;;  %v956_v48 = vpack.c.bf16 %v944_v43, %v943_v42 }
 0x292   : > { %v1724_v49 = vpop.f32.mrb[19].mxu1 }
 0x293   : > { %v907_v50 = vadd.f32 %v1722_v46, %v2564_v63  ;;  %v1725_v51 = vadd.f32 %v1724_v49, %v1723_v47  ;;  %1797 = vmatmul.mubr.bf16.gmra.mrb[36].mxu0 %v956_v48 }
 0x295   : > { %v910_v52 = vadd.f32 %v1725_v51, %v2564_v63  ;;  %v945_v53 = vmax.f32 %v907_v50, 0.0 }
 0x297   : > { %v946_v54 = vmax.f32 %v910_v52, 0.0  ;;  %v1726_v55 = vpop.f32.mrb[20].mxu1 }
 0x298   : > { %v1727_v1 = vpop.f32.mrb[21].mxu1 }
 0x299   : > { %v1728_v2 = vadd.f32 %v1727_v1, %v1726_v55  ;;  %v1729_v56 = vpop.f32.mrb[22].mxu1  ;;  %v957_v57 = vpack.c.bf16 %v946_v54, %v945_v53 }
 0x29a   : > { %v1730_v58 = vpop.f32.mrb[23].mxu1 }
 0x29b   : > { %v915_v59 = vadd.f32 %v1728_v2, %v2564_v63  ;;  %v1731_v60 = vadd.f32 %v1730_v58, %v1729_v56  ;;  %1800 = vmatprep.mubr.bf16.mxu0 %v957_v57 }
 0x29d   : > { %v918_v61 = vadd.f32 %v1731_v60, %v2564_v63  ;;  %v947_v62 = vmax.f32 %v915_v59, 0.0 }
 0x29f   : > { %v948_v0 = vmax.f32 %v918_v61, 0.0  ;;  %v1732_v3 = vpop.f32.mrb[24].mxu1 }
 0x2a0   : > { %v1733_v4 = vpop.f32.mrb[25].mxu1 }
 0x2a1   : > { %v1734_v5 = vadd.f32 %v1733_v4, %v1732_v3  ;;  %v1735_v6 = vpop.f32.mrb[26].mxu1  ;;  %v958_v7 = vpack.c.bf16 %v948_v0, %v947_v62 }
 0x2a2   : > { %v1736_v8 = vpop.f32.mrb[27].mxu1 }
 0x2a3   : > { %v923_v9 = vadd.f32 %v1734_v5, %v2564_v63  ;;  %v1737_v10 = vadd.f32 %v1736_v8, %v1735_v6  ;;  %1801 = vmatmul.mubr.bf16.gmra.mrb[40].mxu0 %v958_v7 }
 0x2a5   : > { %v926_v11 = vadd.f32 %v1737_v10, %v2564_v63  ;;  %v949_v12 = vmax.f32 %v923_v9, 0.0 }
 0x2a7   : > { %v950_v13 = vmax.f32 %v926_v11, 0.0  ;;  %v1738_v14 = vpop.f32.mrb[28].mxu1 }
 0x2a8   : > { %v1739_v15 = vpop.f32.mrb[29].mxu1 }
 0x2a9   : > { %v1740_v16 = vadd.f32 %v1739_v15, %v1738_v14  ;;  %v1741_v17 = vpop.f32.mrb[30].mxu1  ;;  %v959_v18 = vpack.c.bf16 %v950_v13, %v949_v12 }
 0x2aa   : > { %v1742_v19 = vpop.f32.mrb[31].mxu1 }
 0x2ab   : > { %v931_v20 = vadd.f32 %v1740_v16, %v2564_v63  ;;  %v1743_v21 = vadd.f32 %v1742_v19, %v1741_v17  ;;  %1804 = vmatprep.mubr.bf16.mxu0 %v959_v18 }
 0x2ad   : > { %v934_v22 = vadd.f32 %v1743_v21, %v2564_v63  ;;  %v951_v23 = vmax.f32 %v931_v20, 0.0 }
 0x2af   : > { %v952_v24 = vmax.f32 %v934_v22, 0.0  ;;  %v1585_v22 = vld [vmem:[%s2686_s25] ss:$0 sm:$0xff] }
 0x2b1   : > { %v960_v25 = vpack.c.bf16 %v952_v24, %v951_v23 }
 0x2b3   : > { %1805 = vmatmul.mubr.bf16.gmra.mrb[44].mxu0 %v960_v25 }
 0x356   : > { %v1794_v29 = vpop.f32.mrb[32].mxu0 }
 0x357   : > { %v1075_v30 = vadd.f32 %v1794_v29, %v1576_v28  ;;  %v1066_v31 = vpop.f32.mrb[33].mxu0 }
 0x358   : > { %v1067_v32 = vadd.f32 %v1576_v28, %v1066_v31  ;;  %v1795_v33 = vpop.f32.mrb[34].mxu0 }
 0x359   : > { %v1078_v63 = vadd.f32 %v1795_v33, %v1576_v28  ;;  %v1069_v34 = vpop.f32.mrb[35].mxu0  ;;  %v1131_v36 = vmax.f32 %v1075_v30, 0.0 }
 0x35a   : > { %v1070_v35 = vadd.f32 %v1576_v28, %v1069_v34  ;;  %v1129_v38 = vmax.f32 %v1067_v32, 0.0 }
 0x35b   : > { %v1132_v37 = vmax.f32 %v1078_v63, 0.0 }
 0x35c   : > { %v1130_v39 = vmax.f32 %v1070_v35, 0.0 }
 0x35d   : > { %v1146_v40 = vpack.c.bf16 %v1132_v37, %v1131_v36 }
 0x35e   : > { %v1145_v41 = vpack.c.bf16 %v1130_v39, %v1129_v38 }
 0x360   : > { %1824 = vmatprep.mubr.bf16.mxu1 %v1145_v41 }
 0x361   : > { %1825 = vmatmul.mubr.bf16.vlgmr.msra.gmra.mrb[32].mxu1 %v1146_v40 }
 0x366   : > { %v1798_v42 = vpop.f32.mrb[36].mxu0 }
 0x367   : > { %v1091_v43 = vadd.f32 %v1798_v42, %v1576_v28  ;;  %v1082_v44 = vpop.f32.mrb[37].mxu0 }
 0x368   : > { %v1083_v45 = vadd.f32 %v1576_v28, %v1082_v44  ;;  %v1799_v46 = vpop.f32.mrb[38].mxu0 }
 0x369   : > { %v1094_v47 = vadd.f32 %v1799_v46, %v1576_v28  ;;  %v1085_v48 = vpop.f32.mrb[39].mxu0  ;;  %v1135_v50 = vmax.f32 %v1091_v43, 0.0 }
 0x36a   : > { %v1086_v49 = vadd.f32 %v1576_v28, %v1085_v48  ;;  %v1133_v52 = vmax.f32 %v1083_v45, 0.0 }
 0x36b   : > { %v1136_v51 = vmax.f32 %v1094_v47, 0.0 }
 0x36c   : > { %v1134_v53 = vmax.f32 %v1086_v49, 0.0 }
 0x36d   : > { %v1148_v54 = vpack.c.bf16 %v1136_v51, %v1135_v50 }
 0x36e   : > { %v1147_v55 = vpack.c.bf16 %v1134_v53, %v1133_v52 }
 0x370   : > { %1828 = vmatprep.mubr.bf16.mxu1 %v1147_v55 }
 0x371   : > { %1829 = vmatmul.mubr.bf16.gmra.mrb[36].mxu1 %v1148_v54 }
 0x376   : > { %v1802_v1 = vpop.f32.mrb[40].mxu0 }
 0x377   : > { %v1107_v2 = vadd.f32 %v1802_v1, %v1576_v28  ;;  %v1098_v56 = vpop.f32.mrb[41].mxu0 }
 0x378   : > { %v1099_v57 = vadd.f32 %v1576_v28, %v1098_v56  ;;  %v1803_v58 = vpop.f32.mrb[42].mxu0 }
 0x379   : > { %v1110_v59 = vadd.f32 %v1803_v58, %v1576_v28  ;;  %v1101_v60 = vpop.f32.mrb[43].mxu0  ;;  %v1139_v62 = vmax.f32 %v1107_v2, 0.0 }
 0x37a   : > { %v1102_v61 = vadd.f32 %v1576_v28, %v1101_v60  ;;  %v1137_v3 = vmax.f32 %v1099_v57, 0.0 }
 0x37b   : > { %v1140_v0 = vmax.f32 %v1110_v59, 0.0 }
 0x37c   : > { %v1138_v4 = vmax.f32 %v1102_v61, 0.0 }
 0x37d   : > { %v1150_v5 = vpack.c.bf16 %v1140_v0, %v1139_v62 }
 0x37e   : > { %v1149_v6 = vpack.c.bf16 %v1138_v4, %v1137_v3 }
 0x380   : > { %1832 = vmatprep.mubr.bf16.mxu1 %v1149_v6 }
 0x381   : > { %1833 = vmatmul.mubr.bf16.gmra.mrb[40].mxu1 %v1150_v5 }
 0x386   : > { %v1806_v7 = vpop.f32.mrb[44].mxu0 }
 0x387   : > { %v1123_v8 = vadd.f32 %v1806_v7, %v1576_v28  ;;  %v1114_v9 = vpop.f32.mrb[45].mxu0 }
 0x388   : > { %v1115_v10 = vadd.f32 %v1576_v28, %v1114_v9  ;;  %v1807_v11 = vpop.f32.mrb[46].mxu0 }
 0x389   : > { %v1126_v12 = vadd.f32 %v1807_v11, %v1576_v28  ;;  %v1117_v13 = vpop.f32.mrb[47].mxu0  ;;  %v1143_v15 = vmax.f32 %v1123_v8, 0.0 }
 0x38a   : > { %v1118_v14 = vadd.f32 %v1576_v28, %v1117_v13  ;;  %v1141_v17 = vmax.f32 %v1115_v10, 0.0 }
 0x38b   : > { %v1144_v16 = vmax.f32 %v1126_v12, 0.0 }
 0x38c   : > { %v1142_v18 = vmax.f32 %v1118_v14, 0.0 }
 0x38d   : > { %v1152_v19 = vpack.c.bf16 %v1144_v16, %v1143_v15 }
 0x38e   : > { %v1151_v20 = vpack.c.bf16 %v1142_v18, %v1141_v17 }
 0x390   : > { %1836 = vmatprep.mubr.bf16.mxu1 %v1151_v20 }
 0x391   : > { %1837 = vmatmul.mubr.bf16.gmra.mrb[44].mxu1 %v1152_v19 }
 0x434   : > { %v1826_v21 = vpop.f32.mrb[32].mxu1 }
 0x435   : > { %v1258_v23 = vpop.f32.mrb[33].mxu1  ;;  %v1267_v25 = vadd.f32 %v1826_v21, %v1585_v22 }
 0x436   : > { %v1827_v24 = vpop.f32.mrb[34].mxu1  ;;  %v1259_v28 = vadd.f32 %v1585_v22, %v1258_v23 }
 0x437   : > { %v1270_v26 = vadd.f32 %v1827_v24, %v1585_v22  ;;  %v1261_v27 = vpop.f32.mrb[35].mxu1 }
 0x438   : > { %v1262_v29 = vadd.f32 %v1585_v22, %v1261_v27 }
 0x439   : > { %v1641_v30 = vpack.c.bf16 %v1270_v26, %v1267_v25 }
 0x43a   : > { %v1636_v31 = vpack.c.bf16 %v1262_v29, %v1259_v28 }
 0x43b   : > { %1673 = vst [vmem:[%s2589_s20 + $0x8] sm:$0xff] %v1641_v30  }
 0x43c   : > { %1637 = vst [vmem:[%s2589_s20] sm:$0xff] %v1636_v31  }
 0x444   : > { %v1830_v32 = vpop.f32.mrb[36].mxu1 }
 0x445   : > { %v1274_v33 = vpop.f32.mrb[37].mxu1  ;;  %v1283_v34 = vadd.f32 %v1830_v32, %v1585_v22 }
 0x446   : > { %v1831_v63 = vpop.f32.mrb[38].mxu1  ;;  %v1275_v37 = vadd.f32 %v1585_v22, %v1274_v33 }
 0x447   : > { %v1286_v35 = vadd.f32 %v1831_v63, %v1585_v22  ;;  %v1277_v36 = vpop.f32.mrb[39].mxu1 }
 0x448   : > { %v1278_v38 = vadd.f32 %v1585_v22, %v1277_v36 }
 0x449   : > { %v1651_v39 = vpack.c.bf16 %v1286_v35, %v1283_v34 }
 0x44a   : > { %v1646_v40 = vpack.c.bf16 %v1278_v38, %v1275_v37 }
 0x44b   : > { %1675 = vst [vmem:[%s2589_s20 + $0x18] sm:$0xff] %v1651_v39  }
 0x44c   : > { %1674 = vst [vmem:[%s2589_s20 + $0x10] sm:$0xff] %v1646_v40  }
 0x454   : > { %v1834_v41 = vpop.f32.mrb[40].mxu1 }
 0x455   : > { %v1290_v42 = vpop.f32.mrb[41].mxu1  ;;  %v1299_v44 = vadd.f32 %v1834_v41, %v1585_v22 }
 0x456   : > { %v1835_v43 = vpop.f32.mrb[42].mxu1  ;;  %v1291_v47 = vadd.f32 %v1585_v22, %v1290_v42 }
 0x457   : > { %v1302_v45 = vadd.f32 %v1835_v43, %v1585_v22  ;;  %v1293_v46 = vpop.f32.mrb[43].mxu1 }
 0x458   : > { %v1294_v48 = vadd.f32 %v1585_v22, %v1293_v46 }
 0x459   : > { %v1661_v49 = vpack.c.bf16 %v1302_v45, %v1299_v44 }
 0x45a   : > { %v1656_v50 = vpack.c.bf16 %v1294_v48, %v1291_v47 }
 0x45b   : > { %1677 = vst [vmem:[%s2589_s20 + $0x28] sm:$0xff] %v1661_v49  }
 0x45c   : > { %1676 = vst [vmem:[%s2589_s20 + $0x20] sm:$0xff] %v1656_v50  }
 0x464   : > { %v1838_v51 = vpop.f32.mrb[44].mxu1 }
 0x465   : > { %v1306_v52 = vpop.f32.mrb[45].mxu1  ;;  %v1315_v54 = vadd.f32 %v1838_v51, %v1585_v22 }
 0x466   : > { %v1839_v53 = vpop.f32.mrb[46].mxu1  ;;  %v1307_v2 = vadd.f32 %v1585_v22, %v1306_v52 }
 0x467   : > { %v1318_v55 = vadd.f32 %v1839_v53, %v1585_v22  ;;  %v1309_v1 = vpop.f32.mrb[47].mxu1 }
 0x468   : > { %v1310_v56 = vadd.f32 %v1585_v22, %v1309_v1 }
 0x469   : > { %v1671_v57 = vpack.c.bf16 %v1318_v55, %v1315_v54 }
 0x46a   : > { %v1666_v58 = vpack.c.bf16 %v1310_v56, %v1307_v2 }
 0x46b   : > { %1679 = vst [vmem:[%s2589_s20 + $0x38] sm:$0xff] %v1671_v57  }
 0x46c   : > { %1678 = vst [vmem:[%s2589_s20 + $0x30] sm:$0xff] %v1666_v58  }
 0x46d   : > { %2145 = shalt.err (!%p2142_p13)
}
 0x46e   : > { %s2146_s21 = scalar_lea.hbm %s2604_s17, 1024  ;;  %s2150_s19 = scalar_lea.hbm %s2687_s15, 2048 }
 0x46f   : > { %p2147_p0 = scmp.ne.s32.totalorder %s2604_s17, %s2146_s21  ;;  %p2151_p1 = scmp.lt.u32.totalorder %s2604_s17, %s2687_s15 }
 0x470   : > { %p2152_p2 = scmp.lt.u32.totalorder %s2150_s19, %s2146_s21  ;;  %p2154_p8 = scmp.lt.u32.totalorder %s2146_s21, %s2604_s17 }
 0x471   : > { %p2148_p5 = pnand %p2147_p0, %p2425_p6 }
 0x472   : > { %p2153_p4 = por %p2152_p2, %p2151_p1 }
 0x473   : > { %p2149_p11 = pneg %p2148_p5 }
 0x474   : > { %p2155_p10 = por %p2154_p8, %p2153_p4 }
 0x476   : > { %p2156_p12 = pnand %p2155_p10, %p2149_p11 }
 0x478   : > { %2159 = shalt.err (!%p2156_p12)
}
 0x479   : > { %s2219_s30 = smov 64   ;;  %s2220_s16 = smov 4  }
 0x47a   : > { %1858 = dma.vmem_to_hbm [thread:$0]  (%p2425_p6), %s2599_s22, 1024, %s2604_s17, %s1402_s13, %s2219_s30, %s2219_s30, %s2220_s16  }
 0x47b PF: > { %s2688_s23 = sld [smem:[#allocation16_spill]]  ;;  %s2689_s18 = sld [smem:[#allocation17_spill]] }
 0x47c   : > { %p2691_p7 = scmp.ge.s32.totalorder %s2206_s12, 2 }
 0x481   : > { %s1430_s8 = sand.u32 1, %s2688_s23   ;;  %p2690_p3 = scmp.ne.s32.totalorder %s2689_s18, 0 }
 0x482   : > { %s1431_s27 = scalar_lea.sflag [#allocation4], %s1430_s8 }
 0x483   : > { %p1878_p9 = pnand %p2691_p7, %p2690_p3 }
 0x485   : > { %2189 = dma.done.wait (!%p1878_p9), %s1431_s27, 1024  }
 0x486   : > { %2191 = vsyncadd (!%p1878_p9), %s1431_s27, 4294966272  ;;  %p24_p13 = scmp.ge.s32.totalorder %s2415_s28, 4   ;;  %s2692_s30 = smov %s2198_s10 }
 0x487   : > { %s2693_s10 = smov %s2202_s11  ;;  %s2694_s11 = smov %s2431_s26 }
 0x488   : > { %s2695_s12 = smov %s2415_s28  ;;  %26 = sbr.rel (!%p24_p13) target bundleno = 10 (0xa), region = 117 }
 0x48f   :  { %1436 = vsyncpa [#allocation3], 1 }
 0x490   :  { %1438 = vsyncpa [#allocation3 + $0x1], 1 }
 0x491   :  { %1439 = vsyncpa [#allocation6], 1 }
 0x492   :  { %1440 = vsyncpa [#allocation9], 1 }
 0x493   :  { %1441 = vsyncpa [#allocation4], 1 }
 0x494   :  { %1443 = vsyncpa [#allocation4 + $0x1], 1 }

</bundles_post_ra>
